<compile_context>
chip_gen: v7x
topology: tpu7x:2x2x1
jax: 0.10.0
libtpu: 0.0.40
codegen_flags: <defaults>
</compile_context>

<pallas_src>
import functools

import jax
import jax.numpy as jnp
from jax.experimental import pallas as pl
from jax.experimental.pallas import tpu as pltpu


def _conv1d_tap_kernel(x_ref, w_ref, o_ref, *, taps, t_out):
    """One batch element x one C_out tile.

    x_ref: (T + K - 1, C_in)   zero-padded time window (VMEM)
    w_ref: (K, C_in, tile_n)   tap-major weight slices (VMEM)
    o_ref: (T, tile_n)
    """
    acc = jnp.dot(x_ref[0:t_out, :], w_ref[0],
                  preferred_element_type=jnp.float32)
    for k in range(1, taps):  # K is small & static -> unrolled shifted matmuls
        acc = acc + jnp.dot(x_ref[k:k + t_out, :], w_ref[k],
                            preferred_element_type=jnp.float32)
    o_ref[...] = acc.astype(o_ref.dtype)


def cnn_forward(x, weight, *, use_bf16=False):
    """Equivalent of CNN.forward: Conv1d over time, bias=False, 'same' pad.

    x:      (B, T, C_in)      (batch, seq, embedding_dim)
    weight: (C_out, C_in, K)  (PyTorch nn.Conv1d layout)
    returns (B, T, C_out)
    """
    B, T, C_in = x.shape
    C_out, C_in_w, K = weight.shape
    assert C_in == C_in_w
    assert K % 2 == 1, "padding=(K-1)//2 only gives 'same' length for odd K"
    pad = (K - 1) // 2
    T_in = T + 2 * pad

    # Zero-pad time only (no K x im2col blow-up, no padded-contraction reads).
    x_pad = jnp.pad(x, ((0, 0), (pad, pad), (0, 0)))       # (B, T_in, C_in)
    # Tap-major weight: w_t[k] = weight[:, :, k].T  -> (C_in, C_out).
    w_t = jnp.transpose(weight, (2, 1, 0))                  # (K, C_in, C_out)

    compute_dtype = jnp.bfloat16 if use_bf16 else x.dtype
    x_pad = x_pad.astype(compute_dtype)
    w_t = w_t.astype(compute_dtype)

    # C_out tiling: keep the full (possibly masked-store) dim for small C_out;
    # only split when C_out is large and cleanly 128-divisible.
    if C_out > 512 and C_out % 128 == 0:
        tile_n = 512 if C_out % 512 == 0 else (256 if C_out % 256 == 0 else 128)
    else:
        tile_n = C_out
    num_n = C_out // tile_n

    kernel = functools.partial(_conv1d_tap_kernel, taps=K, t_out=T)

    in_item = jnp.dtype(compute_dtype).itemsize
    out_item = jnp.dtype(x.dtype).itemsize
    cost = pl.CostEstimate(
        flops=2 * B * T * K * C_in * C_out,
        transcendentals=0,
        bytes_accessed=(B * T_in * C_in * in_item
                        + K * C_in * C_out * in_item
                        + B * T * C_out * out_item),
    )

    # Double-buffered per-block VMEM estimate; only raise the scoped limit if
    # it would exceed the conservative v5e default, cap at v7x-safe 64 MiB.
    # TODO(synk): for very long sequences, tile the time axis with halo blocks
    # instead of holding the whole padded time window per batch in VMEM.
    vmem_est = 2 * (T_in * C_in * in_item
                    + K * C_in * tile_n * in_item
                    + T * tile_n * out_item)
    cp_kwargs = dict(dimension_semantics=("parallel", "parallel"))
    if vmem_est > (16 << 20):
        cp_kwargs["vmem_limit_bytes"] = int(min(2 * vmem_est, 64 << 20))

    out = pl.pallas_call(
        kernel,
        out_shape=jax.ShapeDtypeStruct((B, T, C_out), x.dtype),
        grid_spec=pltpu.PrefetchScalarGridSpec(
            num_scalar_prefetch=0,
            grid=(B, num_n),
            in_specs=[
                # (batch squeezed, full padded time, full C_in)
                pl.BlockSpec((None, T_in, C_in), lambda b, j: (b, 0, 0)),
                # (all taps, full C_in, C_out tile)
                pl.BlockSpec((K, C_in, tile_n), lambda b, j: (0, 0, j)),
            ],
            out_specs=pl.BlockSpec((None, T, tile_n), lambda b, j: (b, 0, j)),
        ),
        compiler_params=pltpu.CompilerParams(**cp_kwargs),
        cost_estimate=cost,
    )(x_pad, w_t)
    return out


def _reference(x, weight):
    # Pure-JAX reference: Conv1d over time with 'same' padding, no bias.
    B, T, C_in = x.shape
    C_out, _, K = weight.shape
    pad = (K - 1) // 2
    x_pad = jnp.pad(x, ((0, 0), (pad, pad), (0, 0)))
    out = jnp.zeros((B, T, C_out), jnp.float32)
    for k in range(K):
        out = out + jnp.einsum(
            "btc,co->bto", x_pad[:, k:k + T, :], weight[:, :, k].T
        )
    return out


if __name__ == "__main__":
    # config: embedding_dim=32, kernel_size=3
    B, T, C, K = 2, 8, 32, 3

    key = jax.random.PRNGKey(0)
    kx, kw = jax.random.split(key)
    x = jax.random.normal(kx, (B, T, C), dtype=jnp.float32)
    # PyTorch Conv1d weight shape: (out_channels, in_channels, kernel_size)
    weight = jax.random.normal(kw, (C, C, K), dtype=jnp.float32) * 0.1

    y = cnn_forward(x, weight)
    y = jax.block_until_ready(y)

    y_ref = _reference(x, weight)
    assert y.shape == (B, T, C)
    assert jnp.allclose(y, y_ref, atol=1e-4, rtol=1e-4)

    print("KERNEL_OK")
</pallas_src>

<mosaic_0001>
module attributes {stable_mosaic.version = 11 : i64} {
  func.func @_conv1d_tap_kernel(%arg0: i32, %arg1: i32, %arg2: memref<1x10x32xf32, #tpu.memory_space<vmem>>, %arg3: memref<3x32x32xf32, #tpu.memory_space<vmem>>, %arg4: memref<1x8x32xf32, #tpu.memory_space<vmem>>) attributes {dimension_semantics = [#tpu.dimension_semantics<parallel>, #tpu.dimension_semantics<parallel>], iteration_bounds = array<i64: 2, 1>, scalar_prefetch = 0 : i64, scratch_operands = 0 : i64, tpu.core_type = #tpu.core_type<tc>, window_params = [{transform_indices = @transform_0, window_bounds = array<i64: 1, 10, 32>}, {transform_indices = @transform_1, window_bounds = array<i64: 3, 32, 32>}, {transform_indices = @transform_2, window_bounds = array<i64: 1, 8, 32>}]} {
    %c0 = arith.constant 0 : index
    %c0_0 = arith.constant 0 : index
    %c0_1 = arith.constant 0 : index
    %0 = vector.load %arg2[%c0, %c0_0, %c0_1] : memref<1x10x32xf32, #tpu.memory_space<vmem>>, vector<1x8x32xf32>
    %1 = vector.shape_cast %0 : vector<1x8x32xf32> to vector<8x32xf32>
    %c0_2 = arith.constant 0 : index
    %c0_3 = arith.constant 0 : index
    %c0_4 = arith.constant 0 : index
    %2 = vector.load %arg3[%c0_2, %c0_3, %c0_4] : memref<3x32x32xf32, #tpu.memory_space<vmem>>, vector<1x32x32xf32>
    %3 = vector.shape_cast %2 : vector<1x32x32xf32> to vector<32x32xf32>
    %cst = arith.constant dense<0.000000e+00> : vector<8x32xf32>
    %4 = tpu.matmul %1, %3, %cst {dimension_numbers = #tpu.dot_dimension_numbers<[1], [0], [0], [1], [0, 0, 1, 1], [], []>} : vector<8x32xf32>, vector<32x32xf32>, vector<8x32xf32> -> vector<8x32xf32>
    %c0_5 = arith.constant 0 : index
    %c1 = arith.constant 1 : index
    %c0_6 = arith.constant 0 : index
    %5 = vector.load %arg2[%c0_5, %c1, %c0_6] : memref<1x10x32xf32, #tpu.memory_space<vmem>>, vector<1x8x32xf32>
    %6 = vector.shape_cast %5 : vector<1x8x32xf32> to vector<8x32xf32>
    %c1_7 = arith.constant 1 : index
    %c0_8 = arith.constant 0 : index
    %c0_9 = arith.constant 0 : index
    %7 = vector.load %arg3[%c1_7, %c0_8, %c0_9] : memref<3x32x32xf32, #tpu.memory_space<vmem>>, vector<1x32x32xf32>
    %8 = vector.shape_cast %7 : vector<1x32x32xf32> to vector<32x32xf32>
    %cst_10 = arith.constant dense<0.000000e+00> : vector<8x32xf32>
    %9 = tpu.matmul %6, %8, %cst_10 {dimension_numbers = #tpu.dot_dimension_numbers<[1], [0], [0], [1], [0, 0, 1, 1], [], []>} : vector<8x32xf32>, vector<32x32xf32>, vector<8x32xf32> -> vector<8x32xf32>
    %10 = arith.addf %4, %9 : vector<8x32xf32>
    %c0_11 = arith.constant 0 : index
    %c2 = arith.constant 2 : index
    %c0_12 = arith.constant 0 : index
    %11 = vector.load %arg2[%c0_11, %c2, %c0_12] : memref<1x10x32xf32, #tpu.memory_space<vmem>>, vector<1x8x32xf32>
    %12 = vector.shape_cast %11 : vector<1x8x32xf32> to vector<8x32xf32>
    %c2_13 = arith.constant 2 : index
    %c0_14 = arith.constant 0 : index
    %c0_15 = arith.constant 0 : index
    %13 = vector.load %arg3[%c2_13, %c0_14, %c0_15] : memref<3x32x32xf32, #tpu.memory_space<vmem>>, vector<1x32x32xf32>
    %14 = vector.shape_cast %13 : vector<1x32x32xf32> to vector<32x32xf32>
    %cst_16 = arith.constant dense<0.000000e+00> : vector<8x32xf32>
    %15 = tpu.matmul %12, %14, %cst_16 {dimension_numbers = #tpu.dot_dimension_numbers<[1], [0], [0], [1], [0, 0, 1, 1], [], []>} : vector<8x32xf32>, vector<32x32xf32>, vector<8x32xf32> -> vector<8x32xf32>
    %16 = arith.addf %10, %15 : vector<8x32xf32>
    %c0_17 = arith.constant 0 : index
    %c0_18 = arith.constant 0 : index
    %c0_19 = arith.constant 0 : index
    %17 = vector.load %arg4[%c0_17, %c0_18, %c0_19] : memref<1x8x32xf32, #tpu.memory_space<vmem>>, vector<1x8x32xf32>
    %18 = vector.shape_cast %17 : vector<1x8x32xf32> to vector<8x32xf32>
    %19 = vector.shape_cast %16 : vector<8x32xf32> to vector<1x8x32xf32>
    tpu.vector_store %arg4[%c0_17, %c0_18, %c0_19], %19 {strides = array<i32>} : memref<1x8x32xf32, #tpu.memory_space<vmem>>, vector<1x8x32xf32>,
    return
  }
  func.func @transform_0(%arg0: i32, %arg1: i32) -> (i32, i32, i32) {
    %c0_i32 = arith.constant 0 : i32
    %c0_i32_0 = arith.constant 0 : i32
    %c0_i32_1 = arith.constant 0 : i32
    return %arg0, %c0_i32, %c0_i32_0 : i32, i32, i32
  }
  func.func @transform_1(%arg0: i32, %arg1: i32) -> (i32, i32, i32) {
    %c0_i32 = arith.constant 0 : i32
    %c0_i32_0 = arith.constant 0 : i32
    %c0_i32_1 = arith.constant 0 : i32
    return %c0_i32, %c0_i32_0, %arg1 : i32, i32, i32
  }
  func.func @transform_2(%arg0: i32, %arg1: i32) -> (i32, i32, i32) {
    %c0_i32 = arith.constant 0 : i32
    %c0_i32_0 = arith.constant 0 : i32
    return %arg0, %c0_i32, %arg1 : i32, i32, i32
  }
}

</mosaic_0001>

<bundles_post_ra>
// kernel: tpu_custom_call.1
= control target key start
LH: loop header
LB: loop body
LE: loop exit
PB: predicated region body
PF: predicated region fallthrough
CT: control target
= control target key end

     0   :  { %7 = vsyncpa [#allocation3], 0  ;;  %s963_s0 = inlined_call_operand.vmem [shape: f32[2,10,32], index: 0, kind: input, shape index: {}]   ;;  %s964_s1 = inlined_call_operand.hbm [shape: f32[3,32,32], index: 1, kind: input, shape index: {}]   ;;  %s965_s2 = inlined_call_operand.hbm [shape: f32[2,8,32], index: 2, kind: output, shape index: {}]  }
   0x1   :  { %8 = vsyncpa [#allocation4], 0 }
   0x2   :  { %10 = vsyncpa [#allocation4 + $0x1], 0  ;;  %s806_s9 = smov 0   ;;  %s808_s10 = smov 0  }
   0x3   :  { %s810_s11 = smov 0   ;;  %s812_s12 = smov 0  }
   0x4   :  { %s814_s13 = smov 0   ;;  %s816_s14 = smov 0  }
   0x5 LB: > { %s514_s15 = sadd.s32 4294967295, %s782_s14   ;;  %s515_s16 = sadd.s32 4294967294, %s782_s14   ;;  %s782_s14 = sphi %s816_s14, %s16_s14   ;;  %s778_s13 = sphi %s814_s13, %s983_s13   ;;  %s774_s12 = sphi %s812_s12, %s982_s12   ;;  %s770_s11 = sphi %s810_s11, %s981_s11   ;;  %s766_s10 = sphi %s808_s10, %s980_s10   ;;  %s762_s9 = sphi %s806_s9, %s979_s9  }
   0x6   : > { %s28_s17 = sadd.s32 1, %s778_s13  ;;  %s89_s18 = sadd.s32 1, %s770_s11 }
   0x7   : > { %p30_p0 = scmp.ge.s32.totalorder %s28_s17, 2  ;;  %p99_p1 = scmp.ne.s32.totalorder %s770_s11, %s766_s10 }
   0x8   : > { %p100_p2 = scmp.eq.s32.totalorder %s514_s15, 1  ;;  %p105_p3 = scmp.ne.s32.totalorder %s766_s10, %s762_s9 }
   0x9   : > { %s985_s17 = smov (%p30_p0, %s28_s17), 0  ;;  %p106_p5 = scmp.eq.s32.totalorder %s515_s16, 1 }
   0xa   : > { %p846_p4 = por %p100_p2, %p99_p1  ;;  %s84_s20 = ssub.s32 %s778_s13, %s985_s17 }
   0xb   : > { %p516_p6 = scmp.ge.s32.totalorder %s782_s14, 1  ;;  %p87_p7 = scmp.eq.s32.totalorder %s84_s20, 0 }
   0xc   : > { %s970_s19 = scalar_select %p846_p4, 1, 0 }
   0xd   : > { %p853_p8 = por %p106_p5, %p105_p3  ;;  %p113_p9 = scmp.lt.s32.totalorder %s782_s14, 3 }
   0xe   : > { %s859_s22 = scalar_select %p87_p7, %s770_s11, %s89_s18  }
   0xf   : > { %s971_s21 = scalar_select %p853_p8, 1, 0 }
  0x10   : > { %p861_p10 = pnand %p516_p6, %p113_p9  ;;  %p865_p11 = scmp.eq.s32.totalorder %s514_s15, 0 }
  0x11   : > { %s784_s25 = smov [#allocation2]   ;;  %s672_s30 = scalar_lea.hbm %s964_s1, 1536 }
  0x12   : > { %s972_s23 = scalar_select %p861_p10, 1, 0 }
  0x13   : > { %s973_s24 = scalar_select %p865_p11, 1, 0 }
  0x14   : > { %p607_p12 = pneg %p861_p10  ;;  %s127_s26 = sshll.u32 %s784_s25, 4  ;;  %s128_s26 = int_to_ptr.vmem [resolvable:$true] %s127_s26 }
  0x15   : > { %p673_p0 = scmp.ne.s32.totalorder %s964_s1, %s672_s30  ;;  %p679_p5 = scmp.lt.u32.totalorder %s672_s30, %s964_s1 }
  0x16   : > { %p873_p13 = pnand %p865_p11, %p607_p12 }
  0x18   : > { %p674_p1 = pneg %p873_p13 }
  0x1a   : > { %p675_p2 = pnand %p674_p1, %p673_p0 }
  0x1c   : > { %p676_p3 = pneg %p675_p2 }
  0x1e   : > { %p681_p6 = pnand %p679_p5, %p676_p3 }
  0x20   : > { %684 = shalt.err (!%p681_p6)
}
  0x21   : > { %s685_s7 = scalar_lea.vmem %s128_s26, 1536  ;;  %p693_p8 = scmp.lt.s32.totalorder %s128_s26, %s128_s26 }
  0x22   : > { %p686_p7 = scmp.ne.s32.totalorder %s128_s26, %s685_s7  ;;  %p694_p4 = scmp.lt.s32.totalorder %s685_s7, %s685_s7 }
  0x24   : > { %p688_p9 = pnand %p686_p7, %p674_p1  ;;  %p695_p11 = por %p694_p4, %p693_p8 }
  0x26   : > { %p689_p12 = pneg %p688_p9 }
  0x28   : > { %p696_p10 = pnand %p695_p11, %p689_p12 }
  0x2a   : > { %699 = shalt.err (!%p696_p10)
}
  0x2b   : > { %s785_s8 = smov 128   ;;  %s786_s15 = smov 8  }
  0x2c   : > { %610 = dma.hbm_to_vmem [thread:$0]  (!%p873_p13), %s964_s1, 1536, %s128_s26, [#allocation3], %s785_s8, %s785_s8, %s786_s15  }
  0x2d   : > { %p975_p0 = scmp.ne.s32.totalorder %s972_s23, 0 }
  0x2e   : > { %p976_p2 = scmp.ne.s32.totalorder (!%p975_p0), %s973_s24, 0 }
  0x2f   : > { %151 = sbr.rel (%p975_p0) target bundleno = 302 (0x12e), region = 28 }
  0x36   : > { %753 = dma.done.wait (%p976_p2), [#allocation3], 1536  }
  0x37   : > { %755 = vsyncadd (%p976_p2), [#allocation3], 4294965760  ;;  %p173_p4 = scmp.lt.s32.totalorder %s774_s12, 1  ;;  %v787_v0 = vmov 0.0|0.0   ;;  %vm788_vm0 = vmmov 0   ;;  %v789_v1 = vmov 0.0  }
  0x38   : > { %586 = vmatprep.subr.bf16.mxu0 %v787_v0  ;;  %566 = vmatprep.mubr.msk.f32.mxu0 %vm788_vm0, %v789_v1  ;;  %v179_v2 = vld [vmem:[#allocation2] sm:$0xff]  ;;  %v180_v3 = vld [vmem:[#allocation2 + $0x8] sm:$0xff]  ;;  %v181_v4 = vld [vmem:[#allocation2 + $0x10] sm:$0xff]  ;;  %vm189_vm1 = vcmask 261120   ;;  %s170_s27 = sand.u32 1, %s766_s10   ;;  %s528_s29 = sshll.u32 %s774_s12, 7 }
  0x39   : > { %580 = vmatprep.subr.bf16.mxu1 %v787_v0  ;;  %555 = vmatprep.mubr.msk.f32.mxu1 %vm788_vm0, %v789_v1  ;;  %s174_s20 = scalar_select %p173_p4, %s774_s12, 1  ;;  %v587_v5 = vpack.c.bf16 %v180_v3, %v179_v2  ;;  %v182_v6 = vld [vmem:[#allocation2 + $0x18] sm:$0xff]  ;;  %v185_v7 = vld [vmem:[#allocation2 + $0x20] sm:$0xff]  ;;  %v186_v8 = vld [vmem:[#allocation2 + $0x28] sm:$0xff] }
  0x3a   : > { %v590_v9 = vpack.c.bf16 %v182_v6, %v181_v4  ;;  %v581_v10 = vpack.c.bf16 %v186_v8, %v185_v7  ;;  %v187_v11 = vld [vmem:[#allocation2 + $0x30] sm:$0xff]  ;;  %v188_v12 = vld [vmem:[#allocation2 + $0x38] sm:$0xff]  ;;  %v338_v13 = vld [vmem:[#allocation2 + $0x40] sm:$0xff]  ;;  %s521_s28 = sshll.u32 %s170_s27, 3  ;;  %s915_s6 = scalar_lea.hbm %s965_s2, %s528_s29 }
  0x3b   : > { %s531_s23 = sshll.u32 %s174_s20, 4  ;;  %588 = vmatpush3.bf16.msra.mxu0 %v587_v5  ;;  %v339_v14 = vld [vmem:[#allocation2 + $0x48] sm:$0xff]  ;;  %v584_v15 = vpack.c.bf16 %v188_v12, %v187_v11  ;;  %v340_v18 = vld [vmem:[#allocation2 + $0x50] sm:$0xff]  ;;  %v341_v19 = vld [vmem:[#allocation2 + $0x58] sm:$0xff]  ;;  %s172_s30 = scalar_lea.vmem [#allocation5], %s521_s28 }
  0x3c   : > { %589 = vmatprep.subr.bf16.mxu0 %v787_v0  ;;  %s177_s26 = scalar_lea.vmem %s963_s0, %s531_s23  ;;  %582 = vmatpush3.bf16.msra.mxu1 %v581_v10  ;;  %v593_v17 = vpack.c.bf16 %v339_v14, %v338_v13  ;;  %v596_v21 = vpack.c.bf16 %v341_v19, %v340_v18  ;;  %s432_s3 = sshll.u32 %s172_s30, 4  ;;  %s917_s3 = int_to_ptr.vmem [resolvable:$true] %s432_s3 }
  0x3d   : > { %583 = vmatprep.subr.bf16.mxu1 %v787_v0  ;;  %v178_v16 = vld [vmem:[%s177_s26] sm:$0xff]  ;;  %s418_s7 = scalar_lea.sflag [#allocation4], %s170_s27  ;;  %s700_s8 = scalar_lea.vmem %s917_s3, 128 }
  0x3e   : > { %v183_v20 = vld [vmem:[%s177_s26 + $0x1] sm:$0xff]  ;;  %p701_p8 = scmp.ne.s32.totalorder %s917_s3, %s700_s8  ;;  %p977_p10 = scmp.ne.s32.totalorder %s970_s19, 0 }
  0x3f   : > { %591 = vmatpush3.bf16.msra.mxu0 %v590_v9  ;;  %v336_v22 = vld [vmem:[%s177_s26 + $0x2] sm:$0xff]  ;;  %s790_s12 = smov [#allocation5]  }
  0x40   : > { %592 = vmatprep.subr.bf16.mxu0 %v787_v0  ;;  %585 = vmatpush3.bf16.msra.mxu1 %v584_v15  ;;  %p702_p11 = pnand %p701_p8, %p977_p10  ;;  %s704_s15 = sshll.u32 %s790_s12, 4  ;;  %s705_s15 = int_to_ptr.vmem [resolvable:$false] %s704_s15 }
  0x41   : > { %s706_s16 = scalar_lea.vmem %s705_s15, 256  ;;  %p707_p1 = scmp.lt.s32.totalorder %s917_s3, %s705_s15 }
  0x42   : > { %567 = vmatmul.mubr.msk.f32.vlgmr.msra.gmra.mrb[0].mxu0 %vm189_vm1, %v178_v16  ;;  %p703_p13 = pneg %p702_p11  ;;  %p708_p3 = scmp.lt.s32.totalorder %s706_s16, %s700_s8 }
  0x43   : > { %594 = vmatpush3.bf16.msra.mxu0 %v593_v17  ;;  %577 = vmatprep.mubr.msk.f32.mxu0 %vm788_vm0, %v789_v1 }
  0x44   : > { %595 = vmatprep.subr.bf16.mxu0 %v787_v0  ;;  %556 = vmatmul.mubr.msk.f32.vlgmr.msra.gmra.mrb[0].mxu1 %vm189_vm1, %v183_v20  ;;  %p709_p5 = por %p708_p3, %p707_p1 }
  0x46   : > { %p710_p6 = pnand %p709_p5, %p703_p13 }
  0x47   : > { %597 = vmatpush3.bf16.msra.mxu0 %v596_v21 }
  0x4a   : > { %578 = vmatmul.mubr.msk.f32.vlgmr.msra.gmra.mrb[0].mxu0 %vm189_vm1, %v336_v22 }
 0x117   : > { %v259_v23 = vpop.f32.mrb[0].mxu1 }
 0x118   : > { %v557_v24 = vpop.f32.mrb[1].mxu1 }
 0x11d   : > { %v411_v25 = vpop.f32.mrb[0].mxu0 }
 0x11e   : > { %v598_v26 = vadd.f32 %v411_v25, %v259_v23  ;;  %v579_v27 = vpop.f32.mrb[1].mxu0 }
 0x120   : > { %416 = vst.msk [vmem:[%s172_s30] sm:$0xff] %vm189_vm1, %v598_v26 }
 0x121   : > { %713 = shalt.err (!%p710_p6)
}
 0x122   : > { %s714_s18 = scalar_lea.hbm %s915_s6, 128  ;;  %s718_s24 = scalar_lea.hbm %s965_s2, 256 }
 0x123   : > { %p715_p7 = scmp.ne.s32.totalorder %s915_s6, %s714_s18  ;;  %p719_p0 = scmp.lt.u32.totalorder %s915_s6, %s965_s2 }
 0x124   : > { %p720_p2 = scmp.lt.u32.totalorder %s718_s24, %s714_s18  ;;  %p722_p8 = scmp.lt.u32.totalorder %s714_s18, %s915_s6 }
 0x125   : > { %p716_p9 = pnand %p715_p7, %p977_p10 }
 0x126   : > { %p721_p4 = por %p720_p2, %p719_p0 }
 0x127   : > { %p717_p12 = pneg %p716_p9 }
 0x128   : > { %p723_p11 = por %p722_p8, %p721_p4 }
 0x12a   : > { %p724_p13 = pnand %p723_p11, %p717_p12 }
 0x12c   : > { %727 = shalt.err (!%p724_p13)
}
 0x12d   : > { %605 = dma.vmem_to_hbm [thread:$0]  (%p977_p10), %s917_s3, 128, %s915_s6, %s418_s7  }
 0x12e PF: > { %p617_p1 = scmp.ge.s32.totalorder %s782_s14, 2  ;;  %s444_s27 = sand.u32 1, %s762_s9  }
 0x12f   : > { %p978_p3 = scmp.ne.s32.totalorder %s971_s21, 0  ;;  %s445_s28 = scalar_lea.sflag [#allocation4], %s444_s27 }
 0x131   : > { %p612_p5 = pnand %p617_p1, %p978_p3 }
 0x133   : > { %757 = dma.done.wait (!%p612_p5), %s445_s28, 128  }
 0x134   : > { %759 = vsyncadd (!%p612_p5), %s445_s28, 4294967168  ;;  %s16_s14 = sadd.s32 1, %s782_s14   ;;  %s979_s9 = smov %s766_s10 }
 0x135   : > { %p13_p6 = scmp.ge.s32.totalorder %s16_s14, 4   ;;  %s980_s10 = smov %s770_s11 }
 0x136   : > { %s981_s11 = smov %s859_s22  ;;  %s982_s12 = smov %s778_s13 }
 0x137   : > { %s983_s13 = smov %s985_s17  ;;  %15 = sbr.rel (!%p13_p6) target bundleno = 5 (0x5), region = 71 }
 0x13e   :  { %450 = vsyncpa [#allocation3], 1 }
 0x13f   :  { %452 = vsyncpa [#allocation3 + $0x1], 1 }
 0x140   :  { %453 = vsyncpa [#allocation4], 1 }
 0x141   :  { %455 = vsyncpa [#allocation4 + $0x1], 1 }

</bundles_post_ra>
